<compile_context>
chip_gen: v7x
topology: tpu7x:2x2x1
jax: 0.10.0
libtpu: 0.0.40
codegen_flags: <defaults>
</compile_context>

<pallas_src>
import functools

import jax
import jax.numpy as jnp
from jax.experimental import pallas as pl
from jax.experimental.pallas import tpu as pltpu

_LANE = 128        # pad final output columns to this (lane-dense store)
_SUBLANE = 16      # batch-row alignment (covers bf16 (16,128) packing)
_TILE_MAX = 1024   # max rows per grid step
_TILE_SPLIT = 512  # batches above this get split into >=2 parallel tiles


def _round_up(x, m):
    return ((x + m - 1) // m) * m


def _cdiv(a, b):
    return -(-a // b)


def actor_kernel(x_ref,
                 w1_ref, b1_ref,
                 w2_ref, b2_ref,
                 w3_ref, b3_ref,
                 w4_ref, b4_ref,
                 o_ref):
    cdt = w1_ref.dtype  # MXU operand dtype (bf16 by default, f32 debug path)

    # linear1 + ReLU (f32 accumulate, f32 elementwise)
    h = jnp.dot(x_ref[...], w1_ref[...], preferred_element_type=jnp.float32)
    h = jnp.maximum(h + b1_ref[...], 0.0)
    # linear2 + ReLU
    h = jnp.dot(h.astype(cdt), w2_ref[...], preferred_element_type=jnp.float32)
    h = jnp.maximum(h + b2_ref[...], 0.0)
    # linear3 + ReLU
    h = jnp.dot(h.astype(cdt), w3_ref[...], preferred_element_type=jnp.float32)
    h = jnp.maximum(h + b3_ref[...], 0.0)
    # linear4 + Tanh (lane-padded output columns are tanh(0 + 0) = 0)
    h = jnp.dot(h.astype(cdt), w4_ref[...], preferred_element_type=jnp.float32)
    o_ref[...] = jnp.tanh(h + b4_ref[...]).astype(o_ref.dtype)


def _choose_tiling(batch):
    """Return (tile_rows, num_tiles) for the batch grid axis."""
    if batch <= _TILE_SPLIT:
        # One grid step, minimal padding. Overhead-bound regime: splitting a
        # small batch across cores costs more in per-step overhead than it wins.
        tb = _round_up(max(batch, _SUBLANE), _SUBLANE)
        return tb, 1
    # Even tile count (>=2) so v7x's two TensorCores both get work; tiles
    # capped at _TILE_MAX rows and sublane-aligned to minimise padding.
    n_tiles = 2
    while _cdiv(batch, n_tiles) > _TILE_MAX:
        n_tiles += 2
    tb = _round_up(_cdiv(batch, n_tiles), _SUBLANE)
    # Bump to a multiple of 256 (v6e/v7x MXU M-dim) if that adds little padding.
    tb256 = _round_up(tb, 256)
    if tb256 * n_tiles - batch <= max(batch // 8, 256):
        tb = tb256
    return tb, n_tiles


def prepare_actor_params(params, compute_dtype=jnp.bfloat16):
    """One-time cast/pad of parameters (hoisted out of the per-call hot path).

    The last layer's weight and bias are zero-padded to 128 output columns so
    the kernel's store is lane-dense (unmasked vst); the padded columns
    evaluate to tanh(0 + 0) = 0 and are sliced off by the wrapper.  Keep that
    zero-padding invariant if this code is refactored.
    """
    hidden = params["w4"].shape[0]
    out_dim = params["w4"].shape[1]
    out_cols = _round_up(out_dim, _LANE)
    return {
        "w1": params["w1"].astype(compute_dtype),
        "w2": params["w2"].astype(compute_dtype),
        "w3": params["w3"].astype(compute_dtype),
        "w4": jnp.zeros((hidden, out_cols), compute_dtype)
                 .at[:, :out_dim].set(params["w4"].astype(compute_dtype)),
        "b1": params["b1"].astype(jnp.float32).reshape(1, -1),
        "b2": params["b2"].astype(jnp.float32).reshape(1, -1),
        "b3": params["b3"].astype(jnp.float32).reshape(1, -1),
        "b4": jnp.zeros((1, out_cols), jnp.float32)
                 .at[:, :out_dim].set(
                     params["b4"].astype(jnp.float32).reshape(1, -1)),
    }


@functools.partial(jax.jit, static_argnames=("out_dim",))
def actor_forward(x, prepped, out_dim=4):
    """x: (B, in_dim) float32; prepped: output of prepare_actor_params."""
    x = jnp.asarray(x, jnp.float32)
    B, in_dim = x.shape
    compute_dtype = prepped["w1"].dtype
    out_cols = prepped["w4"].shape[1]
    # bf16 output store halves HBM writeback of the padded 128-wide slab; the
    # f32 (debug-only) compute path keeps an f32 store for tight accuracy checks.
    out_dtype = jnp.bfloat16 if compute_dtype == jnp.bfloat16 else jnp.float32

    tb, num_tiles = _choose_tiling(B)
    b_pad = tb * num_tiles

    # Pad/cast x once; fuses with neighbours under jit.
    x_c = jnp.zeros((b_pad, in_dim), compute_dtype).at[:B].set(
        x.astype(compute_dtype))

    def streamed(shape):
        """Block that advances along the batch grid axis."""
        return pl.BlockSpec(shape, lambda i: (i, 0))

    def resident(shape):
        """Full-array block whose index_map ignores the grid index: DMA'd once,
        stays VMEM-resident across all grid steps."""
        return pl.BlockSpec(shape, lambda i: (0,) * len(shape))

    out = pl.pallas_call(
        actor_kernel,
        out_shape=jax.ShapeDtypeStruct((b_pad, out_cols), out_dtype),
        grid=(num_tiles,),
        in_specs=[
            streamed((tb, in_dim)),                    # x streams per tile
            resident(prepped["w1"].shape), resident(prepped["b1"].shape),
            resident(prepped["w2"].shape), resident(prepped["b2"].shape),
            resident(prepped["w3"].shape), resident(prepped["b3"].shape),
            resident(prepped["w4"].shape), resident(prepped["b4"].shape),
        ],
        out_specs=streamed((tb, out_cols)),
        compiler_params=pltpu.CompilerParams(
            dimension_semantics=("parallel",)),
    )(x_c,
      prepped["w1"], prepped["b1"],
      prepped["w2"], prepped["b2"],
      prepped["w3"], prepped["b3"],
      prepped["w4"], prepped["b4"])

    return out[:B, :out_dim].astype(jnp.float32)


def init_actor_params(key, in_dim, hidden=256, out_dim=4):
    """Deterministic synthetic init (uniform, roughly PyTorch-Linear scale)."""
    dims = [(in_dim, hidden), (hidden, hidden), (hidden, hidden),
            (hidden, out_dim)]
    params = {}
    for i, (fan_in, fan_out) in enumerate(dims, start=1):
        key, kw, kb = jax.random.split(key, 3)
        bound = 1.0 / jnp.sqrt(jnp.float32(fan_in))
        params[f"w{i}"] = jax.random.uniform(
            kw, (fan_in, fan_out), jnp.float32, minval=-bound, maxval=bound)
        params[f"b{i}"] = jax.random.uniform(
            kb, (1, fan_out), jnp.float32, minval=-bound, maxval=bound)
    return params


def reference_forward(x, p):
    h = jnp.maximum(x @ p["w1"] + p["b1"], 0.0)
    h = jnp.maximum(h @ p["w2"] + p["b2"], 0.0)
    h = jnp.maximum(h @ p["w3"] + p["b3"], 0.0)
    return jnp.tanh(h @ p["w4"] + p["b4"])


if __name__ == "__main__":
    key = jax.random.PRNGKey(0)

    # dims = {'o': 24, 'g': 8}, use_goal=True  ->  in_features = 32
    dims_o, dims_g = 24, 8
    in_dim = dims_o + dims_g

    key, kx, kx2, kx3, kp = jax.random.split(key, 5)
    params = init_actor_params(kp, in_dim)

    prepped_bf16 = prepare_actor_params(params)                 # shipping config
    prepped_f32 = prepare_actor_params(params, jnp.float32)     # debug-only path

    # Small batch (typical per-step actor evaluation): one 16-row tile.
    x_small = jax.random.normal(kx, (8, in_dim), jnp.float32)
    ref_small = reference_forward(x_small, params)

    out_f32 = jax.block_until_ready(actor_forward(x_small, prepped_f32))
    assert out_f32.shape == (8, 4)
    assert jnp.allclose(out_f32, ref_small, atol=1e-5, rtol=1e-5)

    out_bf16 = jax.block_until_ready(actor_forward(x_small, prepped_bf16))
    assert out_bf16.shape == (8, 4)
    assert jnp.allclose(out_bf16, ref_small, atol=5e-2, rtol=5e-2)

    # Mid-size batch: single adaptive tile (minimal padding, one grid step).
    x_mid = jax.random.normal(kx2, (260, in_dim), jnp.float32)
    out_mid = jax.block_until_ready(actor_forward(x_mid, prepped_bf16))
    ref_mid = reference_forward(x_mid, params)
    assert out_mid.shape == (260, 4)
    assert jnp.allclose(out_mid, ref_mid, atol=5e-2, rtol=5e-2)

    # Large batch: two 256-aligned parallel tiles (v7x megacore path).
    x_big = jax.random.normal(kx3, (1500, in_dim), jnp.float32)
    out_big = jax.block_until_ready(actor_forward(x_big, prepped_bf16))
    ref_big = reference_forward(x_big, params)
    assert out_big.shape == (1500, 4)
    assert jnp.allclose(out_big, ref_big, atol=5e-2, rtol=5e-2)

    print("KERNEL_OK")
</pallas_src>

<mosaic_0001>
module attributes {stable_mosaic.version = 11 : i64} {
  func.func @actor_kernel(%arg0: i32, %arg1: memref<16x32xf32, #tpu.memory_space<vmem>>, %arg2: memref<32x256xf32, #tpu.memory_space<vmem>>, %arg3: memref<1x256xf32, #tpu.memory_space<vmem>>, %arg4: memref<256x256xf32, #tpu.memory_space<vmem>>, %arg5: memref<1x256xf32, #tpu.memory_space<vmem>>, %arg6: memref<256x256xf32, #tpu.memory_space<vmem>>, %arg7: memref<1x256xf32, #tpu.memory_space<vmem>>, %arg8: memref<256x128xf32, #tpu.memory_space<vmem>>, %arg9: memref<1x128xf32, #tpu.memory_space<vmem>>, %arg10: memref<16x128xf32, #tpu.memory_space<vmem>>) attributes {dimension_semantics = [#tpu.dimension_semantics<parallel>], iteration_bounds = array<i64: 1>, scalar_prefetch = 0 : i64, scratch_operands = 0 : i64, tpu.core_type = #tpu.core_type<tc>, window_params = [{transform_indices = @transform_0, window_bounds = array<i64: 16, 32>}, {pipeline_mode = #tpu.pipeline_mode<synchronous>, transform_indices = @transform_1, window_bounds = array<i64: 32, 256>}, {pipeline_mode = #tpu.pipeline_mode<synchronous>, transform_indices = @transform_2, window_bounds = array<i64: 1, 256>}, {pipeline_mode = #tpu.pipeline_mode<synchronous>, transform_indices = @transform_3, window_bounds = array<i64: 256, 256>}, {pipeline_mode = #tpu.pipeline_mode<synchronous>, transform_indices = @transform_4, window_bounds = array<i64: 1, 256>}, {pipeline_mode = #tpu.pipeline_mode<synchronous>, transform_indices = @transform_5, window_bounds = array<i64: 256, 256>}, {pipeline_mode = #tpu.pipeline_mode<synchronous>, transform_indices = @transform_6, window_bounds = array<i64: 1, 256>}, {pipeline_mode = #tpu.pipeline_mode<synchronous>, transform_indices = @transform_7, window_bounds = array<i64: 256, 128>}, {pipeline_mode = #tpu.pipeline_mode<synchronous>, transform_indices = @transform_8, window_bounds = array<i64: 1, 128>}, {transform_indices = @transform_9, window_bounds = array<i64: 16, 128>}]} {
    %c0 = arith.constant 0 : index
    %c0_0 = arith.constant 0 : index
    %0 = vector.load %arg1[%c0, %c0_0] : memref<16x32xf32, #tpu.memory_space<vmem>>, vector<16x32xf32>
    %c0_1 = arith.constant 0 : index
    %c0_2 = arith.constant 0 : index
    %1 = vector.load %arg2[%c0_1, %c0_2] : memref<32x256xf32, #tpu.memory_space<vmem>>, vector<32x256xf32>
    %cst = arith.constant dense<0.000000e+00> : vector<16x256xf32>
    %2 = tpu.matmul %0, %1, %cst {dimension_numbers = #tpu.dot_dimension_numbers<[1], [0], [0], [1], [0, 0, 1, 1], [], []>} : vector<16x32xf32>, vector<32x256xf32>, vector<16x256xf32> -> vector<16x256xf32>
    %c0_3 = arith.constant 0 : index
    %c0_4 = arith.constant 0 : index
    %3 = vector.load %arg3[%c0_3, %c0_4] : memref<1x256xf32, #tpu.memory_space<vmem>>, vector<1x256xf32>
    %4 = vector.broadcast %3 : vector<1x256xf32> to vector<16x256xf32>
    %5 = arith.addf %2, %4 : vector<16x256xf32>
    %cst_5 = arith.constant 0.000000e+00 : f32
    %6 = vector.broadcast %cst_5 : f32 to vector<16x256xf32>
    %7 = arith.maximumf %5, %6 : vector<16x256xf32>
    %c0_6 = arith.constant 0 : index
    %c0_7 = arith.constant 0 : index
    %8 = vector.load %arg4[%c0_6, %c0_7] : memref<256x256xf32, #tpu.memory_space<vmem>>, vector<256x256xf32>
    %cst_8 = arith.constant dense<0.000000e+00> : vector<16x256xf32>
    %9 = tpu.matmul %7, %8, %cst_8 {dimension_numbers = #tpu.dot_dimension_numbers<[1], [0], [0], [1], [0, 0, 1, 1], [], []>} : vector<16x256xf32>, vector<256x256xf32>, vector<16x256xf32> -> vector<16x256xf32>
    %c0_9 = arith.constant 0 : index
    %c0_10 = arith.constant 0 : index
    %10 = vector.load %arg5[%c0_9, %c0_10] : memref<1x256xf32, #tpu.memory_space<vmem>>, vector<1x256xf32>
    %11 = vector.broadcast %10 : vector<1x256xf32> to vector<16x256xf32>
    %12 = arith.addf %9, %11 : vector<16x256xf32>
    %cst_11 = arith.constant 0.000000e+00 : f32
    %13 = vector.broadcast %cst_11 : f32 to vector<16x256xf32>
    %14 = arith.maximumf %12, %13 : vector<16x256xf32>
    %c0_12 = arith.constant 0 : index
    %c0_13 = arith.constant 0 : index
    %15 = vector.load %arg6[%c0_12, %c0_13] : memref<256x256xf32, #tpu.memory_space<vmem>>, vector<256x256xf32>
    %cst_14 = arith.constant dense<0.000000e+00> : vector<16x256xf32>
    %16 = tpu.matmul %14, %15, %cst_14 {dimension_numbers = #tpu.dot_dimension_numbers<[1], [0], [0], [1], [0, 0, 1, 1], [], []>} : vector<16x256xf32>, vector<256x256xf32>, vector<16x256xf32> -> vector<16x256xf32>
    %c0_15 = arith.constant 0 : index
    %c0_16 = arith.constant 0 : index
    %17 = vector.load %arg7[%c0_15, %c0_16] : memref<1x256xf32, #tpu.memory_space<vmem>>, vector<1x256xf32>
    %18 = vector.broadcast %17 : vector<1x256xf32> to vector<16x256xf32>
    %19 = arith.addf %16, %18 : vector<16x256xf32>
    %cst_17 = arith.constant 0.000000e+00 : f32
    %20 = vector.broadcast %cst_17 : f32 to vector<16x256xf32>
    %21 = arith.maximumf %19, %20 : vector<16x256xf32>
    %c0_18 = arith.constant 0 : index
    %c0_19 = arith.constant 0 : index
    %22 = vector.load %arg8[%c0_18, %c0_19] : memref<256x128xf32, #tpu.memory_space<vmem>>, vector<256x128xf32>
    %cst_20 = arith.constant dense<0.000000e+00> : vector<16x128xf32>
    %23 = tpu.matmul %21, %22, %cst_20 {dimension_numbers = #tpu.dot_dimension_numbers<[1], [0], [0], [1], [0, 0, 1, 1], [], []>} : vector<16x256xf32>, vector<256x128xf32>, vector<16x128xf32> -> vector<16x128xf32>
    %c0_21 = arith.constant 0 : index
    %c0_22 = arith.constant 0 : index
    %24 = vector.load %arg9[%c0_21, %c0_22] : memref<1x128xf32, #tpu.memory_space<vmem>>, vector<1x128xf32>
    %25 = vector.broadcast %24 : vector<1x128xf32> to vector<16x128xf32>
    %26 = arith.addf %23, %25 : vector<16x128xf32>
    %27 = math.tanh %26 : vector<16x128xf32>
    %c0_23 = arith.constant 0 : index
    %c0_24 = arith.constant 0 : index
    %28 = vector.load %arg10[%c0_23, %c0_24] : memref<16x128xf32, #tpu.memory_space<vmem>>, vector<16x128xf32>
    tpu.vector_store %arg10[%c0_23, %c0_24], %27 {strides = array<i32>} : memref<16x128xf32, #tpu.memory_space<vmem>>, vector<16x128xf32>,
    return
  }
  func.func @transform_0(%arg0: i32) -> (i32, i32) {
    %c0_i32 = arith.constant 0 : i32
    %c0_i32_0 = arith.constant 0 : i32
    return %arg0, %c0_i32 : i32, i32
  }
  func.func @transform_1(%arg0: i32) -> (i32, i32) {
    %c0_i32 = arith.constant 0 : i32
    %c0_i32_0 = arith.constant 0 : i32
    %c0_i32_1 = arith.constant 0 : i32
    return %c0_i32, %c0_i32_0 : i32, i32
  }
  func.func @transform_2(%arg0: i32) -> (i32, i32) {
    %c0_i32 = arith.constant 0 : i32
    %c0_i32_0 = arith.constant 0 : i32
    %c0_i32_1 = arith.constant 0 : i32
    return %c0_i32, %c0_i32_0 : i32, i32
  }
  func.func @transform_3(%arg0: i32) -> (i32, i32) {
    %c0_i32 = arith.constant 0 : i32
    %c0_i32_0 = arith.constant 0 : i32
    %c0_i32_1 = arith.constant 0 : i32
    return %c0_i32, %c0_i32_0 : i32, i32
  }
  func.func @transform_4(%arg0: i32) -> (i32, i32) {
    %c0_i32 = arith.constant 0 : i32
    %c0_i32_0 = arith.constant 0 : i32
    %c0_i32_1 = arith.constant 0 : i32
    return %c0_i32, %c0_i32_0 : i32, i32
  }
  func.func @transform_5(%arg0: i32) -> (i32, i32) {
    %c0_i32 = arith.constant 0 : i32
    %c0_i32_0 = arith.constant 0 : i32
    %c0_i32_1 = arith.constant 0 : i32
    return %c0_i32, %c0_i32_0 : i32, i32
  }
  func.func @transform_6(%arg0: i32) -> (i32, i32) {
    %c0_i32 = arith.constant 0 : i32
    %c0_i32_0 = arith.constant 0 : i32
    %c0_i32_1 = arith.constant 0 : i32
    return %c0_i32, %c0_i32_0 : i32, i32
  }
  func.func @transform_7(%arg0: i32) -> (i32, i32) {
    %c0_i32 = arith.constant 0 : i32
    %c0_i32_0 = arith.constant 0 : i32
    %c0_i32_1 = arith.constant 0 : i32
    return %c0_i32, %c0_i32_0 : i32, i32
  }
  func.func @transform_8(%arg0: i32) -> (i32, i32) {
    %c0_i32 = arith.constant 0 : i32
    %c0_i32_0 = arith.constant 0 : i32
    %c0_i32_1 = arith.constant 0 : i32
    return %c0_i32, %c0_i32_0 : i32, i32
  }
  func.func @transform_9(%arg0: i32) -> (i32, i32) {
    %c0_i32 = arith.constant 0 : i32
    %c0_i32_0 = arith.constant 0 : i32
    return %arg0, %c0_i32 : i32, i32
  }
}

</mosaic_0001>

<bundles_post_ra>
// kernel: actor_forward.1
= control target key start
LH: loop header
LB: loop body
LE: loop exit
PB: predicated region body
PF: predicated region fallthrough
CT: control target
= control target key end

     0   :  { %14 = vsyncpa [#allocation3], 0  ;;  %s1118_s0 = inlined_call_operand.vmem [shape: f32[16,32], index: 0, kind: input, shape index: {}]   ;;  %s1119_s1 = inlined_call_operand.hbm [shape: f32[32,256], index: 1, kind: input, shape index: {}]   ;;  %s1120_s2 = inlined_call_operand.vmem [shape: f32[1,256], index: 2, kind: input, shape index: {}]   ;;  %s1121_s3 = inlined_call_operand.hbm [shape: f32[256,256], index: 3, kind: input, shape index: {}]   ;;  %s1122_s4 = inlined_call_operand.vmem [shape: f32[1,256], index: 4, kind: input, shape index: {}]   ;;  %s1123_s5 = inlined_call_operand.hbm [shape: f32[256,256], index: 5, kind: input, shape index: {}]   ;;  %s1124_s6 = inlined_call_operand.vmem [shape: f32[1,256], index: 6, kind: input, shape index: {}]   ;;  %s1125_s7 = inlined_call_operand.hbm [shape: f32[256,128], index: 7, kind: input, shape index: {}]   ;;  %s1126_s8 = inlined_call_operand.vmem [shape: f32[1,128], index: 8, kind: input, shape index: {}]   ;;  %s1127_s9 = inlined_call_operand.vmem [shape: f32[16,128], index: 9, kind: output, shape index: {}]  }
   0x1   :  { %15 = vsyncpa [#allocation5], 0 }
   0x2   :  { %16 = vsyncpa [#allocation8], 0  ;;  %s952_s30 = smov [#allocation4]   ;;  %s953_s11 = smov [#allocation2]  }
   0x3   :  { %s38_s10 = sshll.u32 %s952_s30, 4  ;;  %s24_s12 = sshll.u32 %s953_s11, 4  ;;  %s39_s10 = int_to_ptr.vmem [resolvable:$true] %s38_s10  ;;  %s1011_s12 = int_to_ptr.vmem [resolvable:$true] %s24_s12 }
   0x4   :  { %s858_s15 = scalar_lea.hbm %s1121_s3, 8192 }
   0x5   :  { %p859_p0 = scmp.ne.s32.totalorder %s1121_s3, %s858_s15  ;;  %p862_p1 = scmp.lt.u32.totalorder %s858_s15, %s1121_s3 }
   0x7   :  { %p864_p2 = pnand %p862_p1, %p859_p0 }
   0x9   :  { %867 = shalt.err (!%p864_p2)
}
   0xa   :  { %s868_s20 = scalar_lea.vmem %s39_s10, 8192  ;;  %p873_p4 = scmp.lt.s32.totalorder %s39_s10, %s39_s10 }
   0xb   :  { %p869_p3 = scmp.ne.s32.totalorder %s39_s10, %s868_s20  ;;  %p874_p5 = scmp.lt.s32.totalorder %s868_s20, %s868_s20 }
   0xd   :  { %p875_p6 = por %p874_p5, %p873_p4 }
   0xf   :  { %p876_p7 = pnand %p875_p6, %p869_p3 }
  0x11   :  { %879 = shalt.err (!%p876_p7)
}
  0x12   :  { %s954_s21 = smov 256   ;;  %s955_s22 = smov 16  }
  0x13   :  { %44 = dma.hbm_to_vmem [thread:$0]  %s1121_s3, 8192, %s39_s10, [#allocation5], %s954_s21, %s954_s21, %s955_s22  }
  0x14   :  { %s880_s27 = scalar_lea.hbm %s1119_s1, 1024 }
  0x15   :  { %p881_p8 = scmp.ne.s32.totalorder %s1119_s1, %s880_s27  ;;  %p884_p9 = scmp.lt.u32.totalorder %s880_s27, %s1119_s1 }
  0x17   :  { %p886_p10 = pnand %p884_p9, %p881_p8 }
  0x19   :  { %889 = shalt.err (!%p886_p10)
}
  0x1a   :  { %s890_s13 = scalar_lea.vmem %s1011_s12, 1024  ;;  %p895_p12 = scmp.lt.s32.totalorder %s1011_s12, %s1011_s12 }
  0x1b   :  { %p891_p11 = scmp.ne.s32.totalorder %s1011_s12, %s890_s13  ;;  %p896_p13 = scmp.lt.s32.totalorder %s890_s13, %s890_s13 }
  0x1d   :  { %p897_p0 = por %p896_p13, %p895_p12 }
  0x1f   :  { %p898_p1 = pnand %p897_p0, %p891_p11 }
  0x21   :  { %901 = shalt.err (!%p898_p1)
}
  0x22   :  { %30 = dma.hbm_to_vmem [thread:$0]  %s1119_s1, 1024, %s1011_s12, [#allocation3], %s954_s21, %s954_s21, %s955_s22  }
  0x23   :  { %s956_s14 = smov [#allocation6]   ;;  %s957_s16 = smov [#allocation7]  }
  0x24   :  { %s52_s15 = sshll.u32 %s956_s14, 4  ;;  %s66_s17 = sshll.u32 %s957_s16, 4  ;;  %s53_s15 = int_to_ptr.vmem [resolvable:$true] %s52_s15  ;;  %s1048_s17 = int_to_ptr.vmem [resolvable:$true] %s66_s17 }
  0x25   :  { %s902_s20 = scalar_lea.hbm %s1123_s5, 8192 }
  0x26   :  { %p903_p2 = scmp.ne.s32.totalorder %s1123_s5, %s902_s20  ;;  %p906_p3 = scmp.lt.u32.totalorder %s902_s20, %s1123_s5 }
  0x28   :  { %p908_p4 = pnand %p906_p3, %p903_p2 }
  0x2a   :  { %911 = shalt.err (!%p908_p4)
}
  0x2b   :  { %s912_s1 = scalar_lea.vmem %s53_s15, 8192  ;;  %p917_p6 = scmp.lt.s32.totalorder %s53_s15, %s53_s15 }
  0x2c   :  { %p913_p5 = scmp.ne.s32.totalorder %s53_s15, %s912_s1  ;;  %p918_p7 = scmp.lt.s32.totalorder %s912_s1, %s912_s1 }
  0x2e   :  { %p919_p8 = por %p918_p7, %p917_p6 }
  0x30   :  { %p920_p9 = pnand %p919_p8, %p913_p5 }
  0x32   :  { %923 = shalt.err (!%p920_p9)
}
  0x33   :  { %58 = dma.hbm_to_vmem [thread:$0]  %s1123_s5, 8192, %s53_s15, [#allocation5], %s954_s21, %s954_s21, %s955_s22  }
  0x34   :  { %s924_s30 = scalar_lea.hbm %s1125_s7, 4096 }
  0x35   :  { %p925_p10 = scmp.ne.s32.totalorder %s1125_s7, %s924_s30  ;;  %p928_p11 = scmp.lt.u32.totalorder %s924_s30, %s1125_s7 }
  0x37   :  { %p930_p12 = pnand %p928_p11, %p925_p10 }
  0x39   :  { %933 = shalt.err (!%p930_p12)
}
  0x3a   :  { %s934_s14 = scalar_lea.vmem %s1048_s17, 4096  ;;  %p939_p0 = scmp.lt.s32.totalorder %s1048_s17, %s1048_s17 }
  0x3b   :  { %p935_p13 = scmp.ne.s32.totalorder %s1048_s17, %s934_s14  ;;  %p940_p1 = scmp.lt.s32.totalorder %s934_s14, %s934_s14 }
  0x3d   :  { %p941_p2 = por %p940_p1, %p939_p0 }
  0x3f   :  { %p942_p3 = pnand %p941_p2, %p935_p13 }
  0x41   :  { %945 = shalt.err (!%p942_p3)
}
  0x42   :  { %s958_s5 = smov 128   ;;  %s959_s21 = smov 8  }
  0x43   :  { %72 = dma.hbm_to_vmem [thread:$0]  %s1125_s7, 4096, %s1048_s17, [#allocation8], %s958_s5, %s958_s5, %s959_s21  }
  0x44   :  { %946 = dma.done.wait [#allocation3], 1024  }
  0x45   :  { %947 = vsyncadd [#allocation3], 4294966272 }
  0x46   :  { %948 = dma.done.wait [#allocation5], 16384  }
  0x47   :  { %949 = vsyncadd [#allocation5], 4294950912 }
  0x48   :  { %950 = dma.done.wait [#allocation8], 4096  }
  0x49   :  { %951 = vsyncadd [#allocation8], 4294963200  ;;  %v960_v0 = vmov 0.0   ;;  %v90_v1 = vld [vmem:[#allocation2 + $0x8] sm:$0xff]  ;;  %v92_v2 = vld [vmem:[#allocation2 + $0x18] sm:$0xff]  ;;  %vm109_vm0 = vcmask 261120  }
  0x4a   :  { %180 = vmatprep.mubr.f32.mxu0 %v960_v0  ;;  %v89_v3 = vld [vmem:[#allocation2] sm:$0xff]  ;;  %v677_v4 = vpack.c.bf16 %v92_v2, %v90_v1  ;;  %v91_v5 = vld [vmem:[#allocation2 + $0x10] sm:$0xff]  ;;  %v94_v6 = vld [vmem:[#allocation2 + $0x28] sm:$0xff] }
  0x4b   :  { %v96_v7 = vld [vmem:[#allocation2 + $0x38] sm:$0xff]  ;;  %v679_v8 = vpack.c.bf16 %v91_v5, %v89_v3  ;;  %v93_v10 = vld [vmem:[#allocation2 + $0x20] sm:$0xff]  ;;  %v95_v11 = vld [vmem:[#allocation2 + $0x30] sm:$0xff] }
  0x4c   :  { %v681_v9 = vpack.c.bf16 %v96_v7, %v94_v6  ;;  %678 = vmatprep.subr.bf16.mxu0 %v677_v4  ;;  %v198_v12 = vld [vmem:[#allocation4 + $0x8] sm:$0xff]  ;;  %v200_v13 = vld [vmem:[#allocation4 + $0x18] sm:$0xff]  ;;  %v683_v14 = vpack.c.bf16 %v95_v11, %v93_v10  ;;  %v197_v16 = vld [vmem:[#allocation4] sm:$0xff] }
  0x4d   :  { %680 = vmatpush1.bf16.msra.mxu0 %v679_v8  ;;  %v685_v15 = vpack.c.bf16 %v200_v13, %v198_v12  ;;  %v199_v17 = vld [vmem:[#allocation4 + $0x10] sm:$0xff]  ;;  %v202_v18 = vld [vmem:[#allocation4 + $0x28] sm:$0xff]  ;;  %v204_v20 = vld [vmem:[#allocation4 + $0x38] sm:$0xff] }
  0x4e   :  { %682 = vmatprep.subr.bf16.mxu0 %v681_v9  ;;  %v687_v19 = vpack.c.bf16 %v199_v17, %v197_v16  ;;  %v201_v21 = vld [vmem:[#allocation4 + $0x20] sm:$0xff]  ;;  %v203_v22 = vld [vmem:[#allocation4 + $0x30] sm:$0xff]  ;;  %v689_v23 = vpack.c.bf16 %v204_v20, %v202_v18  ;;  %v206_v24 = vld [vmem:[#allocation4 + $0x48] sm:$0xff] }
  0x4f   :  { %686 = vmatprep.subr.bf16.mxu1 %v685_v15  ;;  %v208_v25 = vld [vmem:[#allocation4 + $0x58] sm:$0xff]  ;;  %v691_v26 = vpack.c.bf16 %v203_v22, %v201_v21  ;;  %v87_v27 = vld [vmem:[%s1118_s0] sm:$0xff]  ;;  %v207_v30 = vld [vmem:[#allocation4 + $0x50] sm:$0xff] }
  0x50   :  { %688 = vmatpush1.bf16.msra.mxu1 %v687_v19  ;;  %v693_v28 = vpack.c.bf16 %v208_v25, %v206_v24  ;;  %v205_v29 = vld [vmem:[#allocation4 + $0x40] sm:$0xff]  ;;  %v210_v31 = vld [vmem:[#allocation4 + $0x68] sm:$0xff]  ;;  %v212_v32 = vld [vmem:[#allocation4 + $0x78] sm:$0xff] }
  0x51   :  { %684 = vmatpush1.bf16.msra.mxu0 %v683_v14  ;;  %690 = vmatprep.subr.bf16.mxu1 %v689_v23  ;;  %v695_v33 = vpack.c.bf16 %v207_v30, %v205_v29  ;;  %v88_v34 = vld [vmem:[%s1118_s0 + $0x8] sm:$0xff]  ;;  %v697_v35 = vpack.c.bf16 %v212_v32, %v210_v31  ;;  %v209_v36 = vld [vmem:[#allocation4 + $0x60] sm:$0xff]  ;;  %v211_v37 = vld [vmem:[#allocation4 + $0x70] sm:$0xff] }
  0x52   :  { %v214_v38 = vld [vmem:[#allocation4 + $0x88] sm:$0xff]  ;;  %v216_v39 = vld [vmem:[#allocation4 + $0x98] sm:$0xff]  ;;  %v699_v40 = vpack.c.bf16 %v211_v37, %v209_v36  ;;  %v213_v42 = vld [vmem:[#allocation4 + $0x80] sm:$0xff] }
  0x53   :  { %v701_v41 = vpack.c.bf16 %v216_v39, %v214_v38  ;;  %v215_v43 = vld [vmem:[#allocation4 + $0x90] sm:$0xff]  ;;  %v218_v44 = vld [vmem:[#allocation4 + $0xa8] sm:$0xff]  ;;  %v220_v45 = vld [vmem:[#allocation4 + $0xb8] sm:$0xff] }
  0x54   :  { %636 = vmatmul.mubr.msk.f32.vlgmr.msra.gmra.mrb[0].mxu0 %vm109_vm0, %v87_v27  ;;  %692 = vmatpush1.bf16.msra.mxu1 %v691_v26  ;;  %v703_v46 = vpack.c.bf16 %v215_v43, %v213_v42  ;;  %v705_v47 = vpack.c.bf16 %v220_v45, %v218_v44  ;;  %v217_v48 = vld [vmem:[#allocation4 + $0xa0] sm:$0xff]  ;;  %v219_v49 = vld [vmem:[#allocation4 + $0xb0] sm:$0xff]  ;;  %v222_v50 = vld [vmem:[#allocation4 + $0xc8] sm:$0xff] }
  0x55   :  { %186 = vmatprep.mubr.f32.mxu0 %v960_v0  ;;  %694 = vmatprep.subr.bf16.mxu1 %v693_v28  ;;  %v224_v51 = vld [vmem:[#allocation4 + $0xd8] sm:$0xff]  ;;  %v707_v52 = vpack.c.bf16 %v219_v49, %v217_v48  ;;  %v221_v54 = vld [vmem:[#allocation4 + $0xc0] sm:$0xff]  ;;  %v223_v55 = vld [vmem:[#allocation4 + $0xd0] sm:$0xff] }
  0x56   :  { %v709_v53 = vpack.c.bf16 %v224_v51, %v222_v50  ;;  %v226_v56 = vld [vmem:[#allocation4 + $0xe8] sm:$0xff]  ;;  %v228_v57 = vld [vmem:[#allocation4 + $0xf8] sm:$0xff]  ;;  %v711_v58 = vpack.c.bf16 %v223_v55, %v221_v54  ;;  %v225_v60 = vld [vmem:[#allocation4 + $0xe0] sm:$0xff] }
  0x57   :  { %v713_v59 = vpack.c.bf16 %v228_v57, %v226_v56  ;;  %v227_v61 = vld [vmem:[#allocation4 + $0xf0] sm:$0xff]  ;;  %v230_v62 = vld [vmem:[#allocation4 + $0x108] sm:$0xff]  ;;  %v232_v63 = vld [vmem:[#allocation4 + $0x118] sm:$0xff] }
  0x58   :  { %637 = vmatmul.mubr.msk.f32.gmra.mrb[2].mxu0 %vm109_vm0, %v88_v34  ;;  %696 = vmatpush1.bf16.msra.mxu1 %v695_v33  ;;  %v715_v0 = vpack.c.bf16 %v227_v61, %v225_v60  ;;  %v717_v1 = vpack.c.bf16 %v232_v63, %v230_v62  ;;  %v229_v2 = vld [vmem:[#allocation4 + $0x100] sm:$0xff]  ;;  %v231_v3 = vld [vmem:[#allocation4 + $0x110] sm:$0xff]  ;;  %v234_v4 = vld [vmem:[#allocation4 + $0x128] sm:$0xff] }
  0x59   :  { %698 = vmatprep.subr.bf16.mxu1 %v697_v35  ;;  %v236_v5 = vld [vmem:[#allocation4 + $0x138] sm:$0xff]  ;;  %v719_v6 = vpack.c.bf16 %v231_v3, %v229_v2  ;;  %v233_v8 = vld [vmem:[#allocation4 + $0x120] sm:$0xff]  ;;  %v235_v9 = vld [vmem:[#allocation4 + $0x130] sm:$0xff] }
  0x5a   :  { %v721_v7 = vpack.c.bf16 %v236_v5, %v234_v4  ;;  %v238_v10 = vld [vmem:[#allocation4 + $0x148] sm:$0xff]  ;;  %v240_v11 = vld [vmem:[#allocation4 + $0x158] sm:$0xff]  ;;  %v723_v12 = vpack.c.bf16 %v235_v9, %v233_v8  ;;  %v237_v14 = vld [vmem:[#allocation4 + $0x140] sm:$0xff] }
  0x5b   :  { %v725_v13 = vpack.c.bf16 %v240_v11, %v238_v10  ;;  %v239_v15 = vld [vmem:[#allocation4 + $0x150] sm:$0xff]  ;;  %v242_v16 = vld [vmem:[#allocation4 + $0x168] sm:$0xff]  ;;  %v244_v17 = vld [vmem:[#allocation4 + $0x178] sm:$0xff] }
  0x5c   :  { %700 = vmatpush1.bf16.msra.mxu1 %v699_v40  ;;  %v727_v18 = vpack.c.bf16 %v239_v15, %v237_v14  ;;  %v729_v19 = vpack.c.bf16 %v244_v17, %v242_v16  ;;  %v241_v20 = vld [vmem:[#allocation4 + $0x160] sm:$0xff]  ;;  %v243_v21 = vld [vmem:[#allocation4 + $0x170] sm:$0xff]  ;;  %v246_v22 = vld [vmem:[#allocation4 + $0x188] sm:$0xff] }
  0x5d   :  { %702 = vmatprep.subr.bf16.mxu1 %v701_v41  ;;  %v248_v23 = vld [vmem:[#allocation4 + $0x198] sm:$0xff]  ;;  %v731_v24 = vpack.c.bf16 %v243_v21, %v241_v20  ;;  %v245_v26 = vld [vmem:[#allocation4 + $0x180] sm:$0xff]  ;;  %v247_v27 = vld [vmem:[#allocation4 + $0x190] sm:$0xff] }
  0x5e   :  { %v733_v25 = vpack.c.bf16 %v248_v23, %v246_v22  ;;  %v250_v28 = vld [vmem:[#allocation4 + $0x1a8] sm:$0xff]  ;;  %v252_v29 = vld [vmem:[#allocation4 + $0x1b8] sm:$0xff]  ;;  %v735_v30 = vpack.c.bf16 %v247_v27, %v245_v26  ;;  %v249_v32 = vld [vmem:[#allocation4 + $0x1a0] sm:$0xff] }
  0x5f   :  { %v737_v31 = vpack.c.bf16 %v252_v29, %v250_v28  ;;  %v251_v33 = vld [vmem:[#allocation4 + $0x1b0] sm:$0xff]  ;;  %v254_v34 = vld [vmem:[#allocation4 + $0x1c8] sm:$0xff]  ;;  %v256_v35 = vld [vmem:[#allocation4 + $0x1d8] sm:$0xff] }
  0x60   :  { %704 = vmatpush1.bf16.msra.mxu1 %v703_v46  ;;  %v739_v36 = vpack.c.bf16 %v251_v33, %v249_v32  ;;  %v741_v37 = vpack.c.bf16 %v256_v35, %v254_v34  ;;  %v253_v38 = vld [vmem:[#allocation4 + $0x1c0] sm:$0xff]  ;;  %v255_v39 = vld [vmem:[#allocation4 + $0x1d0] sm:$0xff]  ;;  %v258_v41 = vld [vmem:[#allocation4 + $0x1e8] sm:$0xff] }
  0x61   :  { %706 = vmatprep.subr.bf16.mxu1 %v705_v47  ;;  %v743_v40 = vpack.c.bf16 %v255_v39, %v253_v38  ;;  %v260_v42 = vld [vmem:[#allocation4 + $0x1f8] sm:$0xff]  ;;  %v257_v44 = vld [vmem:[#allocation4 + $0x1e0] sm:$0xff]  ;;  %v259_v45 = vld [vmem:[#allocation4 + $0x1f0] sm:$0xff] }
  0x62   :  { %v745_v43 = vpack.c.bf16 %v260_v42, %v258_v41  ;;  %v747_v46 = vpack.c.bf16 %v259_v45, %v257_v44  ;;  %v355_v47 = vld [vmem:[#allocation6 + $0x8] sm:$0xff]  ;;  %v357_v48 = vld [vmem:[#allocation6 + $0x18] sm:$0xff]  ;;  %v354_v49 = vld [vmem:[#allocation6] sm:$0xff] }
  0x63   :  { %v749_v50 = vpack.c.bf16 %v357_v48, %v355_v47  ;;  %v356_v51 = vld [vmem:[#allocation6 + $0x10] sm:$0xff]  ;;  %v358_v56 = vld [vmem:[#allocation6 + $0x20] sm:$0xff]  ;;  %v395_v42 = vld [vmem:[#allocation6 + $0x148] sm:$0xff] }
  0x64   :  { %708 = vmatpush1.bf16.msra.mxu1 %v707_v52  ;;  %v359_v52 = vld [vmem:[#allocation6 + $0x28] sm:$0xff]  ;;  %v751_v54 = vpack.c.bf16 %v356_v51, %v354_v49  ;;  %v360_v57 = vld [vmem:[#allocation6 + $0x30] sm:$0xff]  ;;  %v362_v62 = vld [vmem:[#allocation6 + $0x40] sm:$0xff] }
  0x65   :  { %710 = vmatprep.subr.bf16.mxu1 %v709_v53  ;;  %v361_v53 = vld [vmem:[#allocation6 + $0x38] sm:$0xff]  ;;  %750 = vmatprep.subr.bf16.mxu0 %v749_v50  ;;  %v755_v60 = vpack.c.bf16 %v360_v57, %v358_v56  ;;  %v364_v63 = vld [vmem:[#allocation6 + $0x50] sm:$0xff]  ;;  %v366_v4 = vld [vmem:[#allocation6 + $0x60] sm:$0xff] }
  0x66   :  { %v753_v55 = vpack.c.bf16 %v361_v53, %v359_v52  ;;  %752 = vmatpush1.bf16.msra.mxu0 %v751_v54  ;;  %v759_v2 = vpack.c.bf16 %v364_v63, %v362_v62  ;;  %v368_v5 = vld [vmem:[#allocation6 + $0x70] sm:$0xff]  ;;  %v370_v10 = vld [vmem:[#allocation6 + $0x80] sm:$0xff]  ;;  %v399_v48 = vld [vmem:[#allocation6 + $0x168] sm:$0xff] }
  0x67   :  { %v763_v8 = vpack.c.bf16 %v368_v5, %v366_v4  ;;  %v372_v11 = vld [vmem:[#allocation6 + $0x90] sm:$0xff]  ;;  %v374_v16 = vld [vmem:[#allocation6 + $0xa0] sm:$0xff]  ;;  %v401_v49 = vld [vmem:[#allocation6 + $0x178] sm:$0xff] }
  0x68   :  { %712 = vmatpush1.bf16.msra.mxu1 %v711_v58  ;;  %v363_v58 = vld [vmem:[#allocation6 + $0x48] sm:$0xff]  ;;  %754 = vmatprep.subr.bf16.mxu0 %v753_v55  ;;  %v767_v14 = vpack.c.bf16 %v372_v11, %v370_v10  ;;  %v376_v17 = vld [vmem:[#allocation6 + $0xb0] sm:$0xff]  ;;  %v378_v22 = vld [vmem:[#allocation6 + $0xc0] sm:$0xff]  ;;  %v793_v51 = vpack.c.bf16 %v401_v49, %v399_v48 }
  0x69   :  { %714 = vmatprep.subr.bf16.mxu1 %v713_v59  ;;  %v365_v59 = vld [vmem:[#allocation6 + $0x58] sm:$0xff]  ;;  %v771_v20 = vpack.c.bf16 %v376_v17, %v374_v16  ;;  %v380_v23 = vld [vmem:[#allocation6 + $0xd0] sm:$0xff]  ;;  %v382_v28 = vld [vmem:[#allocation6 + $0xe0] sm:$0xff] }
  0x6a   :  { %v757_v61 = vpack.c.bf16 %v365_v59, %v363_v58  ;;  %756 = vmatpush1.bf16.msra.mxu0 %v755_v60  ;;  %v775_v26 = vpack.c.bf16 %v380_v23, %v378_v22  ;;  %v384_v29 = vld [vmem:[#allocation6 + $0xf0] sm:$0xff]  ;;  %v386_v34 = vld [vmem:[#allocation6 + $0x100] sm:$0xff]  ;;  %v403_v54 = vld [vmem:[#allocation6 + $0x188] sm:$0xff] }
  0x6b   :  { %v779_v32 = vpack.c.bf16 %v384_v29, %v382_v28  ;;  %v388_v35 = vld [vmem:[#allocation6 + $0x110] sm:$0xff]  ;;  %v398_v52 = vld [vmem:[#allocation6 + $0x160] sm:$0xff]  ;;  %v405_v55 = vld [vmem:[#allocation6 + $0x198] sm:$0xff] }
  0x6c   :  { %716 = vmatpush1.bf16.msra.mxu1 %v715_v0  ;;  %v367_v0 = vld [vmem:[#allocation6 + $0x68] sm:$0xff]  ;;  %758 = vmatprep.subr.bf16.mxu0 %v757_v61  ;;  %v783_v38 = vpack.c.bf16 %v388_v35, %v386_v34  ;;  %v392_v41 = vld [vmem:[#allocation6 + $0x130] sm:$0xff]  ;;  %v797_v57 = vpack.c.bf16 %v405_v55, %v403_v54  ;;  %v402_v58 = vld [vmem:[#allocation6 + $0x180] sm:$0xff] }
  0x6d   :  { %718 = vmatprep.subr.bf16.mxu1 %v717_v1  ;;  %v369_v1 = vld [vmem:[#allocation6 + $0x78] sm:$0xff]  ;;  %v396_v47 = vld [vmem:[#allocation6 + $0x150] sm:$0xff]  ;;  %v407_v60 = vld [vmem:[#allocation6 + $0x1a8] sm:$0xff] }
  0x6e   :  { %v761_v3 = vpack.c.bf16 %v369_v1, %v367_v0  ;;  %760 = vmatpush1.bf16.msra.mxu0 %v759_v2  ;;  %v400_v53 = vld [vmem:[#allocation6 + $0x170] sm:$0xff]  ;;  %v409_v61 = vld [vmem:[#allocation6 + $0x1b8] sm:$0xff]  ;;  %v406_v0 = vld [vmem:[#allocation6 + $0x1a0] sm:$0xff] }
  0x6f   :  { %v795_v56 = vpack.c.bf16 %v400_v53, %v398_v52  ;;  %v404_v59 = vld [vmem:[#allocation6 + $0x190] sm:$0xff]  ;;  %v801_v63 = vpack.c.bf16 %v409_v61, %v407_v60  ;;  %v411_v2 = vld [vmem:[#allocation6 + $0x1c8] sm:$0xff]  ;;  %v417_v29 = vld [vmem:[#allocation6 + $0x1f8] sm:$0xff] }
  0x70   :  { %720 = vmatpush1.bf16.msra.mxu1 %v719_v6  ;;  %v371_v6 = vld [vmem:[#allocation6 + $0x88] sm:$0xff]  ;;  %762 = vmatprep.subr.bf16.mxu0 %v761_v3  ;;  %v799_v62 = vpack.c.bf16 %v404_v59, %v402_v58  ;;  %v408_v1 = vld [vmem:[#allocation6 + $0x1b0] sm:$0xff]  ;;  %v413_v3 = vld [vmem:[#allocation6 + $0x1d8] sm:$0xff] }
  0x71   :  { %722 = vmatprep.subr.bf16.mxu1 %v721_v7  ;;  %v373_v7 = vld [vmem:[#allocation6 + $0x98] sm:$0xff]  ;;  %v803_v4 = vpack.c.bf16 %v408_v1, %v406_v0  ;;  %v805_v5 = vpack.c.bf16 %v413_v3, %v411_v2  ;;  %v415_v28 = vld [vmem:[#allocation6 + $0x1e8] sm:$0xff]  ;;  %v527_v34 = vld [vmem:[#allocation7 + $0x80] sm:$0xff] }
  0x72   :  { %v765_v9 = vpack.c.bf16 %v373_v7, %v371_v6  ;;  %764 = vmatpush1.bf16.msra.mxu0 %v763_v8  ;;  %v99_v6 = vlaneseq  ;;  %v528_v35 = vld [vmem:[#allocation7 + $0x88] sm:$0xff]  ;;  %v515_v49 = vld [vmem:[#allocation7 + $0x20] sm:$0xff]  ;;  %v534_v52 = vld [vmem:[#allocation7 + $0xb8] sm:$0xff] }
  0x73   :  { %v517_v55 = vld [vmem:[#allocation7 + $0x30] sm:$0xff]  ;;  %v536_v58 = vld [vmem:[#allocation7 + $0xc8] sm:$0xff]  ;;  %v519_v61 = vld [vmem:[#allocation7 + $0x40] sm:$0xff] }
  0x74   :  { %724 = vmatpush1.bf16.msra.mxu1 %v723_v12  ;;  %v375_v12 = vld [vmem:[#allocation6 + $0xa8] sm:$0xff]  ;;  %766 = vmatprep.subr.bf16.mxu0 %v765_v9  ;;  %v100_v7 = vshrl.u32 %v99_v6, 7  ;;  %v97_v9 = vld [vmem:[%s1120_s2] sm:$0x3]  ;;  %v538_v0 = vld [vmem:[#allocation7 + $0xd8] sm:$0xff] }
  0x75   :  { %726 = vmatprep.subr.bf16.mxu1 %v725_v13  ;;  %v377_v13 = vld [vmem:[#allocation6 + $0xb8] sm:$0xff]  ;;  %v521_v3 = vld [vmem:[#allocation7 + $0x50] sm:$0xff]  ;;  %v540_v6 = vld [vmem:[#allocation7 + $0xe8] sm:$0xff] }
  0x76   :  { %v769_v15 = vpack.c.bf16 %v377_v13, %v375_v12  ;;  %768 = vmatpush1.bf16.msra.mxu0 %v767_v14  ;;  %v1090_v8 = vsub.s32 0, %v100_v7  ;;  %v1095_v10 = vsub.s32 1, %v100_v7 }
  0x78   :  { %728 = vmatpush1.bf16.msra.mxu1 %v727_v18  ;;  %v379_v18 = vld [vmem:[#allocation6 + $0xc8] sm:$0xff]  ;;  %770 = vmatprep.subr.bf16.mxu0 %v769_v15  ;;  %v102_v11 = vrot.slane %v97_v9, %v1090_v8  ;;  %v106_v12 = vrot.slane %v97_v9, %v1095_v10 }
  0x79   :  { %730 = vmatprep.subr.bf16.mxu1 %v729_v19  ;;  %v381_v19 = vld [vmem:[#allocation6 + $0xd8] sm:$0xff] }
  0x7a   :  { %v773_v21 = vpack.c.bf16 %v381_v19, %v379_v18  ;;  %772 = vmatpush1.bf16.msra.mxu0 %v771_v20 }
  0x7c   :  { %732 = vmatpush1.bf16.msra.mxu1 %v731_v24  ;;  %v383_v24 = vld [vmem:[#allocation6 + $0xe8] sm:$0xff]  ;;  %774 = vmatprep.subr.bf16.mxu0 %v773_v21 }
  0x7d   :  { %734 = vmatprep.subr.bf16.mxu1 %v733_v25  ;;  %v385_v25 = vld [vmem:[#allocation6 + $0xf8] sm:$0xff] }
  0x7e   :  { %v777_v27 = vpack.c.bf16 %v385_v25, %v383_v24  ;;  %776 = vmatpush1.bf16.msra.mxu0 %v775_v26  ;;  %v410_v25 = vld [vmem:[#allocation6 + $0x1c0] sm:$0xff]  ;;  %v412_v26 = vld [vmem:[#allocation6 + $0x1d0] sm:$0xff] }
  0x80   :  { %736 = vmatpush1.bf16.msra.mxu1 %v735_v30  ;;  %v387_v30 = vld [vmem:[#allocation6 + $0x108] sm:$0xff]  ;;  %778 = vmatprep.subr.bf16.mxu0 %v777_v27  ;;  %v807_v27 = vpack.c.bf16 %v412_v26, %v410_v25  ;;  %v523_v26 = vld [vmem:[#allocation7 + $0x60] sm:$0xff] }
  0x81   :  { %738 = vmatprep.subr.bf16.mxu1 %v737_v31  ;;  %v389_v31 = vld [vmem:[#allocation6 + $0x118] sm:$0xff] }
  0x82   :  { %v781_v33 = vpack.c.bf16 %v389_v31, %v387_v30  ;;  %780 = vmatpush1.bf16.msra.mxu0 %v779_v32  ;;  %v809_v30 = vpack.c.bf16 %v417_v29, %v415_v28  ;;  %v414_v31 = vld [vmem:[#allocation6 + $0x1e0] sm:$0xff]  ;;  %v416_v32 = vld [vmem:[#allocation6 + $0x1f0] sm:$0xff] }
  0x83   :  { %v541_v29 = vld [vmem:[#allocation7 + $0xf0] sm:$0xff] }
  0x84   :  { %740 = vmatpush1.bf16.msra.mxu1 %v739_v36  ;;  %v391_v36 = vld [vmem:[#allocation6 + $0x128] sm:$0xff]  ;;  %782 = vmatprep.subr.bf16.mxu0 %v781_v33  ;;  %v811_v33 = vpack.c.bf16 %v416_v32, %v414_v31  ;;  %v525_v32 = vld [vmem:[#allocation7 + $0x70] sm:$0xff] }
  0x85   :  { %742 = vmatprep.subr.bf16.mxu1 %v741_v37  ;;  %v393_v37 = vld [vmem:[#allocation6 + $0x138] sm:$0xff] }
  0x86   :  { %v785_v39 = vpack.c.bf16 %v393_v37, %v391_v36  ;;  %784 = vmatpush1.bf16.msra.mxu0 %v783_v38  ;;  %v511_v36 = vld [vmem:[#allocation7] sm:$0xff]  ;;  %v813_v37 = vpack.c.bf16 %v528_v35, %v527_v34  ;;  %v512_v38 = vld [vmem:[#allocation7 + $0x8] sm:$0xff] }
  0x87   :  { %v418_v35 = vld [vmem:[%s1124_s6] sm:$0x3] }
  0x88   :  { %744 = vmatpush1.bf16.msra.mxu1 %v743_v40  ;;  %v390_v40 = vld [vmem:[#allocation6 + $0x120] sm:$0xff]  ;;  %786 = vmatprep.subr.bf16.mxu0 %v785_v39  ;;  %v529_v39 = vld [vmem:[#allocation7 + $0x90] sm:$0xff] }
  0x89   :  { %746 = vmatprep.subr.bf16.mxu1 %v745_v43  ;;  %v397_v43 = vld [vmem:[#allocation6 + $0x158] sm:$0xff]  ;;  %v787_v44 = vpack.c.bf16 %v392_v41, %v390_v40  ;;  %v815_v41 = vpack.c.bf16 %v512_v38, %v511_v36  ;;  %v423_v36 = vrot.slane %v418_v35, %v1090_v8 }
  0x8a   :  { %v789_v45 = vpack.c.bf16 %v397_v43, %v395_v42  ;;  %v530_v40 = vld [vmem:[#allocation7 + $0x98] sm:$0xff]  ;;  %v513_v43 = vld [vmem:[#allocation7 + $0x10] sm:$0xff] }
  0x8b   :  { %788 = vmatpush1.bf16.msra.mxu0 %v787_v44  ;;  %v817_v42 = vpack.c.bf16 %v530_v40, %v529_v39  ;;  %v514_v44 = vld [vmem:[#allocation7 + $0x18] sm:$0xff] }
  0x8c   :  { %748 = vmatpush1.bf16.msra.mxu1 %v747_v46  ;;  %v394_v46 = vld [vmem:[#allocation6 + $0x140] sm:$0xff]  ;;  %790 = vmatprep.subr.bf16.mxu0 %v789_v45 }
  0x8d   :  { %v791_v50 = vpack.c.bf16 %v396_v47, %v394_v46  ;;  %v531_v45 = vld [vmem:[#allocation7 + $0xa0] sm:$0xff]  ;;  %814 = vmatprep.subr.bf16.mxu1 %v813_v37  ;;  %v532_v46 = vld [vmem:[#allocation7 + $0xa8] sm:$0xff]  ;;  %v819_v47 = vpack.c.bf16 %v514_v44, %v513_v43  ;;  %v427_v37 = vrot.slane %v418_v35, %v1095_v10 }
  0x8e   :  { %v821_v48 = vpack.c.bf16 %v532_v46, %v531_v45 }
  0x8f   :  { %792 = vmatpush1.bf16.msra.mxu0 %v791_v50  ;;  %v516_v50 = vld [vmem:[#allocation7 + $0x28] sm:$0xff] }
  0x90   :  { %794 = vmatprep.subr.bf16.mxu0 %v793_v51  ;;  %v533_v51 = vld [vmem:[#allocation7 + $0xb0] sm:$0xff]  ;;  %v823_v53 = vpack.c.bf16 %v516_v50, %v515_v49 }
  0x91   :  { %v825_v54 = vpack.c.bf16 %v534_v52, %v533_v51 }
  0x93   :  { %796 = vmatpush1.bf16.msra.mxu0 %v795_v56  ;;  %v518_v56 = vld [vmem:[#allocation7 + $0x38] sm:$0xff] }
  0x94   :  { %798 = vmatprep.subr.bf16.mxu0 %v797_v57  ;;  %v535_v57 = vld [vmem:[#allocation7 + $0xc0] sm:$0xff]  ;;  %v827_v59 = vpack.c.bf16 %v518_v56, %v517_v55 }
  0x95   :  { %v829_v60 = vpack.c.bf16 %v536_v58, %v535_v57 }
  0x97   :  { %800 = vmatpush1.bf16.msra.mxu0 %v799_v62  ;;  %v520_v62 = vld [vmem:[#allocation7 + $0x48] sm:$0xff] }
  0x98   :  { %802 = vmatprep.subr.bf16.mxu0 %v801_v63  ;;  %v537_v63 = vld [vmem:[#allocation7 + $0xd0] sm:$0xff]  ;;  %v831_v1 = vpack.c.bf16 %v520_v62, %v519_v61 }
  0x99   :  { %v833_v2 = vpack.c.bf16 %v538_v0, %v537_v63 }
  0x9b   :  { %804 = vmatpush1.bf16.msra.mxu0 %v803_v4  ;;  %v522_v4 = vld [vmem:[#allocation7 + $0x58] sm:$0xff] }
  0x9c   :  { %806 = vmatprep.subr.bf16.mxu0 %v805_v5  ;;  %v539_v5 = vld [vmem:[#allocation7 + $0xe0] sm:$0xff]  ;;  %v835_v7 = vpack.c.bf16 %v522_v4, %v521_v3 }
  0x9d   :  { %v837_v9 = vpack.c.bf16 %v540_v6, %v539_v5 }
  0x9f   :  { %808 = vmatpush1.bf16.msra.mxu0 %v807_v27  ;;  %v524_v27 = vld [vmem:[#allocation7 + $0x68] sm:$0xff] }
  0xa0   :  { %810 = vmatprep.subr.bf16.mxu0 %v809_v30  ;;  %v839_v28 = vpack.c.bf16 %v524_v27, %v523_v26  ;;  %v542_v30 = vld [vmem:[#allocation7 + $0xf8] sm:$0xff] }
  0xa1   :  { %v841_v31 = vpack.c.bf16 %v542_v30, %v541_v29 }
  0xa3   :  { %812 = vmatpush1.bf16.msra.mxu0 %v811_v33  ;;  %v526_v33 = vld [vmem:[#allocation7 + $0x78] sm:$0xff] }
  0xa4   :  { %v843_v34 = vpack.c.bf16 %v526_v33, %v525_v32 }
 0x127   :  { %v182_v13 = vpop.f32.mrb[0].mxu0 }
 0x128   :  { %v183_v14 = vadd.f32 %v182_v13, %v102_v11  ;;  %v184_v15 = vpop.f32.mrb[1].mxu0 }
 0x129   :  { %v185_v16 = vadd.f32 %v184_v15, %v106_v12 }
 0x12a   :  { %v193_v19 = vmax.f32 %v183_v14, 0.0 }
 0x12b   :  { %v188_v17 = vpop.f32.mrb[2].mxu0  ;;  %v194_v18 = vmax.f32 %v185_v16, 0.0 }
 0x12c   :  { %v189_v20 = vadd.f32 %v188_v17, %v102_v11  ;;  %v190_v21 = vpop.f32.mrb[3].mxu0  ;;  %v261_v11 = vld [vmem:[%s1122_s4] sm:$0x3] }
 0x12d   :  { %v191_v22 = vadd.f32 %v190_v21, %v106_v12  ;;  %337 = vmatprep.mubr.f32.mxu1 %v194_v18  ;;  %v266_v12 = vrot.slane %v261_v11, %v1090_v8  ;;  %v270_v13 = vrot.slane %v261_v11, %v1095_v10  ;;  %v638_v8 = vld [vmem:[%s1126_s8] ss:$0 sm:$0xff] }
 0x12e   :  { %338 = vmatmul.mubr.f32.vlgmr.msra.gmra.mrb[0].mxu1 %v193_v19  ;;  %v195_v24 = vmax.f32 %v189_v20, 0.0 }
 0x12f   :  { %v196_v23 = vmax.f32 %v191_v22, 0.0  ;;  %816 = vmatpush3.bf16.msra.mxu1 %v815_v41 }
 0x130   :  { %818 = vmatprep.subr.bf16.mxu1 %v817_v42 }
 0x131   :  { %343 = vmatprep.mubr.f32.mxu1 %v196_v23 }
 0x132   :  { %344 = vmatmul.mubr.f32.gmra.mrb[2].mxu1 %v195_v24 }
 0x133   :  { %820 = vmatpush3.bf16.msra.mxu1 %v819_v47 }
 0x134   :  { %822 = vmatprep.subr.bf16.mxu1 %v821_v48 }
 0x137   :  { %824 = vmatpush3.bf16.msra.mxu1 %v823_v53 }
 0x138   :  { %826 = vmatprep.subr.bf16.mxu1 %v825_v54 }
 0x13b   :  { %828 = vmatpush3.bf16.msra.mxu1 %v827_v59 }
 0x13c   :  { %830 = vmatprep.subr.bf16.mxu1 %v829_v60 }
 0x13f   :  { %832 = vmatpush3.bf16.msra.mxu1 %v831_v1 }
 0x140   :  { %834 = vmatprep.subr.bf16.mxu1 %v833_v2 }
 0x143   :  { %836 = vmatpush3.bf16.msra.mxu1 %v835_v7 }
 0x144   :  { %838 = vmatprep.subr.bf16.mxu1 %v837_v9 }
 0x147   :  { %840 = vmatpush3.bf16.msra.mxu1 %v839_v28 }
 0x148   :  { %842 = vmatprep.subr.bf16.mxu1 %v841_v31 }
 0x14b   :  { %844 = vmatpush3.bf16.msra.mxu1 %v843_v34 }
 0x201   :  { %v339_v14 = vpop.f32.mrb[0].mxu1 }
 0x202   :  { %v340_v15 = vadd.f32 %v339_v14, %v266_v12  ;;  %v341_v16 = vpop.f32.mrb[1].mxu1 }
 0x203   :  { %v342_v17 = vadd.f32 %v341_v16, %v270_v13 }
 0x204   :  { %v350_v20 = vmax.f32 %v340_v15, 0.0 }
 0x205   :  { %v351_v18 = vmax.f32 %v342_v17, 0.0  ;;  %v345_v19 = vpop.f32.mrb[2].mxu1 }
 0x206   :  { %v346_v21 = vadd.f32 %v345_v19, %v266_v12  ;;  %v347_v22 = vpop.f32.mrb[3].mxu1 }
 0x207   :  { %v348_v23 = vadd.f32 %v347_v22, %v270_v13  ;;  %494 = vmatprep.mubr.f32.mxu0 %v351_v18 }
 0x208   :  { %495 = vmatmul.mubr.f32.vlgmr.msra.gmra.mrb[4].mxu0 %v350_v20  ;;  %v352_v25 = vmax.f32 %v346_v21, 0.0 }
 0x209   :  { %v353_v24 = vmax.f32 %v348_v23, 0.0 }
 0x20b   :  { %500 = vmatprep.mubr.f32.mxu0 %v353_v24 }
 0x20c   :  { %501 = vmatmul.mubr.f32.gmra.mrb[6].mxu0 %v352_v25 }
 0x2db   :  { %v496_v38 = vpop.f32.mrb[4].mxu0 }
 0x2dc   :  { %v497_v39 = vadd.f32 %v496_v38, %v423_v36  ;;  %v498_v40 = vpop.f32.mrb[5].mxu0 }
 0x2dd   :  { %v499_v41 = vadd.f32 %v498_v40, %v427_v37 }
 0x2de   :  { %v507_v44 = vmax.f32 %v497_v39, 0.0 }
 0x2df   :  { %v508_v42 = vmax.f32 %v499_v41, 0.0  ;;  %v502_v43 = vpop.f32.mrb[6].mxu0 }
 0x2e0   :  { %v503_v45 = vadd.f32 %v502_v43, %v423_v36  ;;  %v504_v46 = vpop.f32.mrb[7].mxu0 }
 0x2e1   :  { %v505_v47 = vadd.f32 %v504_v46, %v427_v37  ;;  %614 = vmatprep.mubr.f32.mxu1 %v508_v42 }
 0x2e2   :  { %615 = vmatmul.mubr.f32.vlgmr.msra.gmra.mrb[4].mxu1 %v507_v44  ;;  %v509_v49 = vmax.f32 %v503_v45, 0.0 }
 0x2e3   :  { %v510_v48 = vmax.f32 %v505_v47, 0.0 }
 0x2e5   :  { %619 = vmatprep.mubr.f32.mxu1 %v510_v48 }
 0x2e6   :  { %620 = vmatmul.mubr.f32.gmra.mrb[6].mxu1 %v509_v49 }
 0x3b5   :  { %v671_v50 = vpop.f32.mrb[4].mxu1 }
 0x3b6   :  { %v672_v10 = vpop.f32.mrb[5].mxu1 }
 0x3b7   :  { %v673_v51 = vadd.f32 %v672_v10, %v671_v50 }
 0x3b9   :  { %v617_v52 = vadd.f32 %v673_v51, %v638_v8  ;;  %v674_v53 = vpop.f32.mrb[6].mxu1 }
 0x3ba   :  { %v675_v54 = vpop.f32.mrb[7].mxu1 }
 0x3bb   :  { %854 = vtanh.f32 %v617_v52  ;;  %v676_v55 = vadd.f32 %v675_v54, %v674_v53 }
 0x3bd   :  { %v622_v56 = vadd.f32 %v676_v55, %v638_v8 }
 0x3bf   :  { %856 = vtanh.f32 %v622_v56 }
 0x3c5   :  { %v855_v57 = vpop.eup %854 }
 0x3c6   :  { %627 = vst [vmem:[%s1127_s9] sm:$0xff] %v855_v57 }
 0x3c9   :  { %v857_v58 = vpop.eup %856 }
 0x3ca   :  { %628 = vst [vmem:[%s1127_s9 + $0x8] sm:$0xff] %v857_v58 }
 0x3cb   :  { %633 = vsyncpa [#allocation3], 1 }
 0x3cc   :  { %634 = vsyncpa [#allocation5], 1 }
 0x3cd   :  { %635 = vsyncpa [#allocation8], 1 }

</bundles_post_ra>
